<compile_context>
chip_gen: v6e
topology: v6e:2x2x1
jax: 0.10.0
libtpu: 0.0.40
codegen_flags: <defaults>
</compile_context>

<pallas_src>
import math

import jax
import jax.numpy as jnp
from jax.experimental import pallas as pl
from jax.experimental.pallas import tpu as pltpu

SMOOTH = 1e-5
_LANES = 128
_BLOCK_BUDGET_BYTES = 4 * 1024 * 1024   # combined input bytes per grid step
_VMEM_LIMIT_BYTES = 32 * 1024 * 1024    # safe scoped limit on v5e/v6e/v7x


def _sublane_granularity(dtype):
    # Native sublane tile rows: f32 -> 8, bf16/f16 -> 16, int8/uint8 -> 32.
    return max(8, 32 // jnp.dtype(dtype).itemsize)


def _choose_tj(nj, c, dtypes, budget):
    """Spatial tile size (in 128-lane rows): largest tile within the combined
    input-byte budget, aligned to the sublane granularity of every input
    dtype.  tj need not divide nj — tail blocks are masked in-kernel."""
    bytes_per_row = c * _LANES * sum(jnp.dtype(d).itemsize for d in dtypes)
    max_tj = max(1, budget // bytes_per_row)
    if nj <= max_tj:
        return nj                                   # full extent: always legal
    gran = 1
    for d in dtypes:
        gran = math.lcm(gran, _sublane_granularity(d))
    tj = max(gran, (max_tj // gran) * gran)
    return nj if tj >= nj else tj


def _make_dice_partial_kernel(nj, tj, binary_targets, approx_reciprocal):
    need_mask = (nj % tj) != 0

    def kernel(logits_ref, targets_ref, out_ref):
        # logits_ref/targets_ref: (1, C, tj, 128) blocks in their native dtype;
        # cast to f32 right after the load (free VPU op, no wrapper HBM copy).
        x = logits_ref[0].astype(jnp.float32)        # (C, tj, 128)
        t = targets_ref[0].astype(jnp.float32)       # (C, tj, 128)

        # softmax over the class axis (leading axis -> elementwise VPU, no XLU).
        m = jnp.max(x, axis=0, keepdims=True)        # (1, tj, 128)
        e = jnp.exp(x - m)
        denom = jnp.sum(e, axis=0, keepdims=True)
        if approx_reciprocal:
            inv = pl.reciprocal(denom, approx=True)  # EUP slot (v7x VALU relief)
        else:
            inv = 1.0 / denom                        # exact: meets 1e-5 tolerance
        p = e * inv                                  # (C, tj, 128)

        if need_mask:
            # Masked tail block: rows beyond the true spatial extent contain
            # padded garbage -> zero them before the reductions.
            j = pl.program_id(1)
            valid = jnp.minimum(tj, nj - j * tj)
            row = jax.lax.broadcasted_iota(jnp.int32, (1, tj, _LANES), 1)
            mask = row < valid
            p = jnp.where(mask, p, 0.0)
            t = jnp.where(mask, t, 0.0)

        # Reduce only the sublane (tj) axis; keep the 128 lanes resident so all
        # stores are lane-dense/unmasked.  Cross-lane / cross-tile / cross-batch
        # reduce is a tiny wrapper-side sum.
        out_ref[0, 0, 0, :, :] = jnp.sum(p * t, axis=1)        # intersect
        out_ref[0, 0, 1, :, :] = jnp.sum(p * p, axis=1)        # z_sum
        if binary_targets:
            out_ref[0, 0, 2, :, :] = jnp.sum(t, axis=1)        # t*t == t (binary)
        else:
            out_ref[0, 0, 2, :, :] = jnp.sum(t * t, axis=1)    # y_sum (general)

    return kernel


def dice_per_class_pallas(logits, targets, *, assume_binary_targets=False,
                          approx_reciprocal=False,
                          block_budget_bytes=_BLOCK_BUDGET_BYTES):
    """logits/targets: (B, C, *spatial) arrays (any dtype). Returns per-class
    dice, shape (C,).  `assume_binary_targets` is only valid for {0,1} targets."""
    assert logits.shape == targets.shape, "logits & targets shape do not match"
    B, C = logits.shape[:2]
    HW = 1
    for s in logits.shape[2:]:
        HW *= s
    # TODO(synk): pad / mask the lane axis for spatial sizes not divisible by 128.
    assert HW % _LANES == 0, "prod(spatial dims) must be a multiple of 128"
    nj = HW // _LANES

    # Free reshapes of the contiguous NC(HW) layout — no transpose, no astype.
    lt = logits.reshape(B, C, nj, _LANES)
    tt = targets.reshape(B, C, nj, _LANES)

    tj = _choose_tj(nj, C, (lt.dtype, tt.dtype), block_budget_bytes)
    n_jtiles = pl.cdiv(nj, tj)
    grid = (B, n_jtiles)

    kernel = _make_dice_partial_kernel(nj, tj, assume_binary_targets,
                                       approx_reciprocal)

    partials = pl.pallas_call(
        kernel,
        out_shape=jax.ShapeDtypeStruct((B, n_jtiles, 3, C, _LANES), jnp.float32),
        grid_spec=pltpu.PrefetchScalarGridSpec(
            num_scalar_prefetch=0,
            grid=grid,
            in_specs=[
                pl.BlockSpec((1, C, tj, _LANES), lambda b, j: (b, 0, j, 0)),
                pl.BlockSpec((1, C, tj, _LANES), lambda b, j: (b, 0, j, 0)),
            ],
            out_specs=pl.BlockSpec((1, 1, 3, C, _LANES),
                                   lambda b, j: (b, j, 0, 0, 0)),
        ),
        compiler_params=pltpu.CompilerParams(
            dimension_semantics=("parallel", "parallel"),
            vmem_limit_bytes=_VMEM_LIMIT_BYTES),
    )(lt, tt)

    # Tiny final reduction (batch, spatial tiles, lanes) and dice ratio in XLA.
    sums = jnp.sum(partials, axis=(0, 1, 4))                  # (3, C)
    intersect, z_sum, y_sum = sums[0], sums[1], sums[2]
    return (2.0 * intersect + SMOOTH) / (z_sum + y_sum + SMOOTH)


def dice_func_forward(logits, targets, num_classes, weight=None,
                      ignore_index=(0,), assume_binary_targets=False):
    """Mirrors Dice_func.forward: returns (mean_dice, -log(mean_dice**2), cls_dice)."""
    cls_dice_all = dice_per_class_pallas(
        logits, targets, assume_binary_targets=assume_binary_targets)
    valid = [c for c in range(num_classes) if c not in ignore_index]
    cls_dice = cls_dice_all[jnp.array(valid)]
    num_valid = num_classes - len(ignore_index)
    dice = jnp.sum(cls_dice) / num_valid
    # `weight` only scales the LOSS value, which Dice_func.forward never returns.
    return dice, -jnp.log(dice ** 2), cls_dice


# ----------------------------- pure-JAX reference ----------------------------
def _reference_cls_dice(logits, targets):
    p = jax.nn.softmax(logits.astype(jnp.float32), axis=1)
    t = targets.astype(jnp.float32)
    red_axes = (0,) + tuple(range(2, p.ndim))
    inter = jnp.sum(p * t, axis=red_axes)
    z = jnp.sum(p * p, axis=red_axes)
    y = jnp.sum(t * t, axis=red_axes)
    return (2.0 * inter + SMOOTH) / (z + y + SMOOTH)


def _reference_forward(logits, targets, num_classes, ignore_index=(0,)):
    cls_all = _reference_cls_dice(logits, targets)
    valid = [c for c in range(num_classes) if c not in ignore_index]
    cls = cls_all[jnp.array(valid)]
    nv = num_classes - len(ignore_index)
    d = jnp.sum(cls) / nv
    return d, -jnp.log(d ** 2), cls


if __name__ == "__main__":
    # --- primary small-shape test: NCHW f32 logits + one-hot int8 targets ----
    B, C, H, W = 2, 4, 16, 16          # H*W = 256 (multiple of 128)
    num_classes = C
    weight = jnp.ones((num_classes,), jnp.float32)  # unused in returned outputs

    key = jax.random.PRNGKey(0)
    k1, k2, k3 = jax.random.split(key, 3)
    logits = jax.random.normal(k1, (B, C, H, W), dtype=jnp.float32)
    labels = jax.random.randint(k2, (B, H, W), 0, C)
    targets_i8 = jnp.transpose(jax.nn.one_hot(labels, C, dtype=jnp.int8),
                               (0, 3, 1, 2))       # NCHW, int8 (binary)

    dice, neg_log, cls_dice = dice_func_forward(
        logits, targets_i8, num_classes, weight=weight, ignore_index=(0,),
        assume_binary_targets=True)
    jax.block_until_ready((dice, neg_log, cls_dice))

    r_dice, r_neg_log, r_cls = _reference_forward(
        logits, targets_i8.astype(jnp.float32), num_classes, ignore_index=(0,))
    assert jnp.allclose(dice, r_dice, rtol=1e-5, atol=1e-5)
    assert jnp.allclose(neg_log, r_neg_log, rtol=1e-5, atol=1e-5)
    assert jnp.allclose(cls_dice, r_cls, rtol=1e-5, atol=1e-5)

    # --- second test: forces spatial tiling + a masked tail block ------------
    # nj = 56*48/128 = 21; with a 30 KiB budget tj = 8 -> 3 tiles, tail = 5 rows.
    B2, C2, H2, W2 = 1, 3, 56, 48
    kl, kt = jax.random.split(k3)
    logits2 = jax.random.normal(kl, (B2, C2, H2, W2), dtype=jnp.float32)
    targets2 = jax.random.uniform(kt, (B2, C2, H2, W2), dtype=jnp.float32)

    cls2 = dice_per_class_pallas(logits2, targets2,
                                 block_budget_bytes=30 * 1024)
    jax.block_until_ready(cls2)
    r_cls2 = _reference_cls_dice(logits2, targets2)
    assert jnp.allclose(cls2, r_cls2, rtol=1e-5, atol=1e-5)

    print("KERNEL_OK")
</pallas_src>

<mosaic_0001>
module attributes {stable_mosaic.version = 11 : i64} {
  func.func @kernel(%arg0: i32, %arg1: i32, %arg2: memref<1x4x2x128xf32, #tpu.memory_space<vmem>>, %arg3: memref<1x4x2x128xi8, #tpu.memory_space<vmem>>, %arg4: memref<1x1x3x4x128xf32, #tpu.memory_space<vmem>>) attributes {dimension_semantics = [#tpu.dimension_semantics<parallel>, #tpu.dimension_semantics<parallel>], iteration_bounds = array<i64: 2, 1>, scalar_prefetch = 0 : i64, scratch_operands = 0 : i64, tpu.core_type = #tpu.core_type<tc>, window_params = [{transform_indices = @transform_0, window_bounds = array<i64: 1, 4, 2, 128>}, {transform_indices = @transform_1, window_bounds = array<i64: 1, 4, 2, 128>}, {transform_indices = @transform_2, window_bounds = array<i64: 1, 1, 3, 4, 128>}]} {
    %c0 = arith.constant 0 : index
    %c0_0 = arith.constant 0 : index
    %c0_1 = arith.constant 0 : index
    %c0_2 = arith.constant 0 : index
    %0 = vector.load %arg2[%c0, %c0_0, %c0_1, %c0_2] : memref<1x4x2x128xf32, #tpu.memory_space<vmem>>, vector<1x4x2x128xf32>
    %1 = vector.shape_cast %0 : vector<1x4x2x128xf32> to vector<4x2x128xf32>
    %c0_3 = arith.constant 0 : index
    %c0_4 = arith.constant 0 : index
    %c0_5 = arith.constant 0 : index
    %c0_6 = arith.constant 0 : index
    %2 = vector.load %arg3[%c0_3, %c0_4, %c0_5, %c0_6] : memref<1x4x2x128xi8, #tpu.memory_space<vmem>>, vector<1x4x2x128xi8>
    %3 = vector.shape_cast %2 : vector<1x4x2x128xi8> to vector<4x2x128xi8>
    %4 = arith.sitofp %3 : vector<4x2x128xi8> to vector<4x2x128xf32>
    %cst = arith.constant dense<0xFF800000> : vector<2x128xf32>
    %5 = vector.multi_reduction <maximumf>, %1, %cst [0] : vector<4x2x128xf32> to vector<2x128xf32>
    %6 = vector.shape_cast %5 : vector<2x128xf32> to vector<1x2x128xf32>
    %7 = vector.broadcast %6 : vector<1x2x128xf32> to vector<4x2x128xf32>
    %8 = arith.subf %1, %7 : vector<4x2x128xf32>
    %9 = math.exp %8 : vector<4x2x128xf32>
    %cst_7 = arith.constant dense<0.000000e+00> : vector<2x128xf32>
    %10 = vector.multi_reduction <add>, %9, %cst_7 [0] : vector<4x2x128xf32> to vector<2x128xf32>
    %11 = vector.shape_cast %10 : vector<2x128xf32> to vector<1x2x128xf32>
    %cst_8 = arith.constant 1.000000e+00 : f32
    %12 = vector.broadcast %cst_8 : f32 to vector<1x2x128xf32>
    %13 = arith.divf %12, %11 : vector<1x2x128xf32>
    %14 = vector.broadcast %13 : vector<1x2x128xf32> to vector<4x2x128xf32>
    %15 = arith.mulf %9, %14 : vector<4x2x128xf32>
    %16 = arith.mulf %15, %4 : vector<4x2x128xf32>
    %cst_9 = arith.constant dense<0.000000e+00> : vector<4x128xf32>
    %17 = vector.multi_reduction <add>, %16, %cst_9 [1] : vector<4x2x128xf32> to vector<4x128xf32>
    %c0_10 = arith.constant 0 : index
    %c0_11 = arith.constant 0 : index
    %c0_12 = arith.constant 0 : index
    %c0_13 = arith.constant 0 : index
    %c0_14 = arith.constant 0 : index
    %18 = vector.load %arg4[%c0_10, %c0_11, %c0_12, %c0_13, %c0_14] : memref<1x1x3x4x128xf32, #tpu.memory_space<vmem>>, vector<1x1x1x4x128xf32>
    %19 = vector.shape_cast %18 : vector<1x1x1x4x128xf32> to vector<4x128xf32>
    %20 = vector.shape_cast %17 : vector<4x128xf32> to vector<1x1x1x4x128xf32>
    tpu.vector_store %arg4[%c0_10, %c0_11, %c0_12, %c0_13, %c0_14], %20 {strides = array<i32>} : memref<1x1x3x4x128xf32, #tpu.memory_space<vmem>>, vector<1x1x1x4x128xf32>,
    %21 = arith.mulf %15, %15 : vector<4x2x128xf32>
    %cst_15 = arith.constant dense<0.000000e+00> : vector<4x128xf32>
    %22 = vector.multi_reduction <add>, %21, %cst_15 [1] : vector<4x2x128xf32> to vector<4x128xf32>
    %c0_16 = arith.constant 0 : index
    %c0_17 = arith.constant 0 : index
    %c1 = arith.constant 1 : index
    %c0_18 = arith.constant 0 : index
    %c0_19 = arith.constant 0 : index
    %23 = vector.load %arg4[%c0_16, %c0_17, %c1, %c0_18, %c0_19] : memref<1x1x3x4x128xf32, #tpu.memory_space<vmem>>, vector<1x1x1x4x128xf32>
    %24 = vector.shape_cast %23 : vector<1x1x1x4x128xf32> to vector<4x128xf32>
    %25 = vector.shape_cast %22 : vector<4x128xf32> to vector<1x1x1x4x128xf32>
    tpu.vector_store %arg4[%c0_16, %c0_17, %c1, %c0_18, %c0_19], %25 {strides = array<i32>} : memref<1x1x3x4x128xf32, #tpu.memory_space<vmem>>, vector<1x1x1x4x128xf32>,
    %cst_20 = arith.constant dense<0.000000e+00> : vector<4x128xf32>
    %26 = vector.multi_reduction <add>, %4, %cst_20 [1] : vector<4x2x128xf32> to vector<4x128xf32>
    %c0_21 = arith.constant 0 : index
    %c0_22 = arith.constant 0 : index
    %c2 = arith.constant 2 : index
    %c0_23 = arith.constant 0 : index
    %c0_24 = arith.constant 0 : index
    %27 = vector.load %arg4[%c0_21, %c0_22, %c2, %c0_23, %c0_24] : memref<1x1x3x4x128xf32, #tpu.memory_space<vmem>>, vector<1x1x1x4x128xf32>
    %28 = vector.shape_cast %27 : vector<1x1x1x4x128xf32> to vector<4x128xf32>
    %29 = vector.shape_cast %26 : vector<4x128xf32> to vector<1x1x1x4x128xf32>
    tpu.vector_store %arg4[%c0_21, %c0_22, %c2, %c0_23, %c0_24], %29 {strides = array<i32>} : memref<1x1x3x4x128xf32, #tpu.memory_space<vmem>>, vector<1x1x1x4x128xf32>,
    return
  }
  func.func @transform_0(%arg0: i32, %arg1: i32) -> (i32, i32, i32, i32) {
    %c0_i32 = arith.constant 0 : i32
    %c0_i32_0 = arith.constant 0 : i32
    %c0_i32_1 = arith.constant 0 : i32
    return %arg0, %c0_i32, %arg1, %c0_i32_0 : i32, i32, i32, i32
  }
  func.func @transform_1(%arg0: i32, %arg1: i32) -> (i32, i32, i32, i32) {
    %c0_i32 = arith.constant 0 : i32
    %c0_i32_0 = arith.constant 0 : i32
    %c0_i32_1 = arith.constant 0 : i32
    return %arg0, %c0_i32, %arg1, %c0_i32_0 : i32, i32, i32, i32
  }
  func.func @transform_2(%arg0: i32, %arg1: i32) -> (i32, i32, i32, i32, i32) {
    %c0_i32 = arith.constant 0 : i32
    %c0_i32_0 = arith.constant 0 : i32
    %c0_i32_1 = arith.constant 0 : i32
    %c0_i32_2 = arith.constant 0 : i32
    return %arg0, %arg1, %c0_i32, %c0_i32_0, %c0_i32_1 : i32, i32, i32, i32, i32
  }
}

</mosaic_0001>

<bundles_post_ra>
// kernel: tpu_custom_call.1
= control target key start
LH: loop header
LB: loop body
LE: loop exit
PB: predicated region body
PF: predicated region fallthrough
CT: control target
= control target key end

     0   :  { %7 = vsyncpa [#allocation3], 0  ;;  %s925_s0 = inlined_call_operand.hbm [shape: f32[2,4,2,128], index: 0, kind: input, shape index: {}]   ;;  %s926_s1 = inlined_call_operand.vmem [shape: s8[2,4,2,128], index: 1, kind: input, shape index: {}]   ;;  %s927_s2 = inlined_call_operand.hbm [shape: f32[2,1,3,4,128], index: 2, kind: output, shape index: {}]  }
   0x1   :  { %9 = vsyncpa [#allocation3 + $0x1], 0 }
   0x2   :  { %10 = vsyncpa [#allocation4], 0 }
   0x3   :  { %12 = vsyncpa [#allocation4 + $0x1], 0  ;;  %s722_s9 = smov 0   ;;  %s724_s10 = smov 0  }
   0x4   :  { %s726_s11 = smov 0   ;;  %s728_s12 = smov 0  }
   0x5   :  { %s730_s13 = smov 0   ;;  %s732_s14 = smov 0  }
   0x6 LB: > { %s497_s15 = sadd.s32 4294967295, %s699_s14   ;;  %s498_s16 = sadd.s32 4294967294, %s699_s14   ;;  %s699_s14 = sphi %s732_s14, %s18_s14   ;;  %s695_s13 = sphi %s730_s13, %s938_s13   ;;  %s691_s12 = sphi %s728_s12, %s937_s12   ;;  %s687_s11 = sphi %s726_s11, %s936_s11   ;;  %s683_s10 = sphi %s724_s10, %s935_s10   ;;  %s679_s9 = sphi %s722_s9, %s934_s9  }
   0x7   : > { %s30_s17 = sadd.s32 1, %s695_s13  ;;  %s39_s18 = sadd.s32 1, %s687_s11 }
   0x8   : > { %p32_p0 = scmp.ge.s32.totalorder %s30_s17, 2  ;;  %p46_p1 = scmp.ne.s32.totalorder %s687_s11, %s683_s10 }
   0x9   : > { %p47_p2 = scmp.eq.s32.totalorder %s699_s14, 0  ;;  %p52_p3 = scmp.ne.s32.totalorder %s683_s10, %s679_s9 }
   0xa   : > { %s940_s17 = smov (%p32_p0, %s30_s17), 0  ;;  %p53_p5 = scmp.eq.s32.totalorder %s497_s15, 0 }
   0xb   : > { %p763_p4 = por %p47_p2, %p46_p1  ;;  %s34_s20 = ssub.s32 %s695_s13, %s940_s17 }
   0xc   : > { %p106_p6 = scmp.eq.s32.totalorder %s497_s15, 1  ;;  %p37_p7 = scmp.eq.s32.totalorder %s34_s20, 0 }
   0xd   : > { %p769_p8 = por %p53_p5, %p52_p3  ;;  %p112_p10 = scmp.eq.s32.totalorder %s498_s16, 1 }
   0xe   : > { %p773_p9 = por %p106_p6, %p46_p1  ;;  %p527_p13 = scmp.lt.s32.totalorder %s699_s14, 2 }
   0xf   : > { %s778_s23 = scalar_select %p37_p7, %s687_s11, %s39_s18  }
  0x10   : > { %p780_p11 = por %p112_p10, %p52_p3  ;;  %s132_s25 = sand.u32 1, %s687_s11  }
  0x11   : > { %s501_s26 = sshll.u32 %s132_s25, 3  ;;  %s512_s27 = sshll.u32 %s695_s13, 7 }
  0x12   : > { %s143_s30 = scalar_lea.hbm %s925_s0, %s512_s27  ;;  %s136_s3 = scalar_lea.vmem [#allocation2], %s501_s26 }
  0x13   : > { %s144_s4 = sshll.u32 %s136_s3, 4  ;;  %p793_p0 = pnand %p527_p13, %p763_p4  ;;  %s145_s4 = int_to_ptr.vmem [resolvable:$true] %s144_s4 }
  0x14   : > { %p504_p1 = scmp.ge.s32.totalorder %s699_s14, 1  ;;  %s133_s6 = scalar_lea.sflag [#allocation3], %s132_s25 }
  0x15   : > { %p593_p2 = pneg %p793_p0  ;;  %s604_s7 = scalar_lea.vmem %s145_s4, 128 }
  0x16   : > { %p605_p3 = scmp.ne.s32.totalorder %s145_s4, %s604_s7  ;;  %s701_s8 = smov [#allocation2]  }
  0x17   : > { %s609_s15 = sshll.u32 %s701_s8, 4  ;;  %s610_s15 = int_to_ptr.vmem [resolvable:$false] %s609_s15 }
  0x18   : > { %p607_p5 = pnand %p605_p3, %p593_p2  ;;  %s611_s16 = scalar_lea.vmem %s610_s15, 256 }
  0x19   : > { %p612_p7 = scmp.lt.s32.totalorder %s145_s4, %s610_s15  ;;  %p613_p10 = scmp.lt.s32.totalorder %s611_s16, %s604_s7 }
  0x1a   : > { %p608_p6 = pneg %p607_p5 }
  0x1b   : > { %p614_p12 = por %p613_p10, %p612_p7 }
  0x1d   : > { %p615_p4 = pnand %p614_p12, %p608_p6 }
  0x1f   : > { %618 = shalt.err (!%p615_p4)
}
  0x20   : > { %s702_s18 = smov 32   ;;  %s703_s19 = smov 2  }
  0x21   : > { %522 = dma.hbm_to_vmem [thread:$0]  (!%p793_p0), %s143_s30, 128, %s145_s4, %s133_s6, %s702_s18, %s702_s18, %s703_s19  }
  0x22   : > { %p162_p13 = scmp.lt.s32.totalorder %s699_s14, 3 }
  0x24   : > { %p163_p2 = pnand %p504_p1, %p162_p13 }
  0x25   : > { %s806_s20 = sand.u32 (!%p163_p2), 1, %s683_s10  }
  0x26   : > { %166 = sbr.rel (%p163_p2) target bundleno = 129 (0x81), region = 28  ;;  %s505_s25 = sshll.u32 (!%p163_p2), %s806_s20, 3 }
  0x27   : > { %s169_s26 = scalar_lea.sflag (!%p163_p2), [#allocation3], %s806_s20  ;;  %s172_s27 = scalar_lea.vmem (!%p163_p2), [#allocation2], %s505_s25 }
  0x2b   : > { %670 = dma.done.wait (%p769_p8), %s169_s26, 128  }
  0x2c   : > { %672 = vsyncadd (%p769_p8), %s169_s26, 4294967168  ;;  %p200_p12 = scmp.lt.s32.totalorder %s691_s12, 1  ;;  %vm223_vm0 = vcmask 1041408   ;;  %v207_v0 = vld [vmem:[%s172_s27] sm:$0x3]  ;;  %s513_s21 = smul.u32 12, %s806_s20 }
  0x2d   : > { %v208_v1 = vld [vmem:[%s172_s27 + $0x2] sm:$0x3]  ;;  %v209_v2 = vld [vmem:[%s172_s27 + $0x4] sm:$0x3]  ;;  %v210_v3 = vld [vmem:[%s172_s27 + $0x6] sm:$0x3] }
  0x2e   : > { %s201_s28 = scalar_select %p200_p12, %s691_s12, 1  ;;  %v224_v10 = vsel %vm223_vm0, %v207_v0, -inf  ;;  %v225_v11 = vsel %vm223_vm0, %v208_v1, -inf  ;;  %v226_v14 = vsel %vm223_vm0, %v209_v2, -inf  ;;  %v227_v15 = vsel %vm223_vm0, %v210_v3, -inf }
  0x2f   : > { %v228_v18 = vmax.f32 %v224_v10, %v225_v11  ;;  %v229_v19 = vmax.f32 %v226_v14, %v227_v15  ;;  %vm292_vm1 = vcmask 1041409   ;;  %vm294_vm2 = vcmask 1042434   ;;  %s843_s5 = scalar_lea.vmem [#allocation5], %s513_s21  ;;  %s514_s6 = smul.u32 192, %s691_s12 }
  0x30   : > { %s506_s29 = sshll.u32 %s201_s28, 2  ;;  %vm296_vm3 = vcmask 1043459   ;;  %s396_s7 = sshll.u32 %s843_s5, 4  ;;  %s874_s7 = int_to_ptr.vmem [resolvable:$true] %s396_s7 }
  0x31   : > { %s206_s4 = scalar_lea.vmem %s926_s1, %s506_s29  ;;  %v230_v22 = vmax.f32 %v228_v18, %v229_v19  ;;  %s872_s12 = scalar_lea.hbm %s927_s2, %s514_s6 }
  0x32   : > { %v211_v4 = vld [vmem:[%s206_s4] sm:$0x1]  ;;  %v212_v5 = vld [vmem:[%s206_s4 + $0x1] sm:$0x1]  ;;  %v213_v6 = vld [vmem:[%s206_s4 + $0x2] sm:$0x1] }
  0x33   : > { %v214_v7 = vld [vmem:[%s206_s4 + $0x3] sm:$0x1]  ;;  %v215_v8 = vunpack.c.0.s8 %v211_v4  ;;  %v216_v9 = vunpack.c.0.s8 %v212_v5  ;;  %v217_v12 = vunpack.c.0.s8 %v213_v6  ;;  %v231_v29 = vsub.f32 %v207_v0, %v230_v22  ;;  %s381_s16 = scalar_lea.sflag [#allocation4], %s806_s20  ;;  %s619_s18 = scalar_lea.vmem %s874_s7, 192 }
  0x34   : > { %v218_v13 = vunpack.c.0.s8 %v214_v7  ;;  %v232_v30 = vsub.f32 %v208_v1, %v230_v22  ;;  %v233_v31 = vsub.f32 %v209_v2, %v230_v22  ;;  %v234_v32 = vsub.f32 %v210_v3, %v230_v22  ;;  %p620_p8 = scmp.ne.s32.totalorder %s874_s7, %s619_s18  ;;  %s704_s19 = smov [#allocation5]  }
  0x35   : > { %v823_v16 = vcvt.s32.f32 %v215_v8  ;;  %v825_v17 = vcvt.s32.f32 %v216_v9  ;;  %v827_v20 = vcvt.s32.f32 %v217_v12  ;;  %v235_v37 = vmul.f32 1.442695, %v231_v29  ;;  %s623_s25 = sshll.u32 %s704_s19, 4  ;;  %s624_s25 = int_to_ptr.vmem [resolvable:$false] %s623_s25 }
  0x36   : > { %v829_v21 = vcvt.s32.f32 %v218_v13  ;;  %v237_v38 = vmul.f32 1.442695, %v232_v30  ;;  %v239_v39 = vmul.f32 1.442695, %v233_v31  ;;  %v241_v40 = vmul.f32 1.442695, %v234_v32  ;;  %p621_p0 = pnand %p620_p8, %p773_p9  ;;  %p626_p3 = scmp.lt.s32.totalorder %s874_s7, %s624_s25 }
  0x37   : > { %v342_v23 = vsel %vm223_vm0, %v823_v16, 0.0  ;;  %v349_v24 = vsel %vm223_vm0, %v825_v17, 0.0  ;;  %v356_v27 = vsel %vm223_vm0, %v827_v20, 0.0  ;;  %581 = vpow2.f32 %v235_v37  ;;  %s625_s26 = scalar_lea.vmem %s624_s25, 384 }
  0x38   : > { %v343_v25 = vrot.slane %v342_v23, 4  ;;  %v350_v26 = vrot.slane %v349_v24, 4  ;;  %v363_v28 = vsel %vm223_vm0, %v829_v21, 0.0  ;;  %v357_v35 = vrot.slane %v356_v27, 4  ;;  %p622_p1 = pneg %p621_p0  ;;  %p627_p5 = scmp.lt.s32.totalorder %s625_s26, %s619_s18 }
  0x39   : > { %v364_v36 = vrot.slane %v363_v28, 4  ;;  %583 = vpow2.f32 %v237_v38 }
  0x3a   : > { %v344_v33 = vadd.f32 %v343_v25, %v342_v23  ;;  %v351_v34 = vadd.f32 %v350_v26, %v349_v24  ;;  %v358_v43 = vadd.f32 %v357_v35, %v356_v27  ;;  %585 = vpow2.f32 %v239_v39  ;;  %p628_p6 = por %p627_p5, %p626_p3 }
  0x3b   : > { %v365_v44 = vadd.f32 %v364_v36, %v363_v28  ;;  %587 = vpow2.f32 %v241_v40 }
  0x3c   : > { %v345_v41 = vrot.slane %v344_v33, 2  ;;  %v352_v42 = vrot.slane %v351_v34, 2  ;;  %v359_v47 = vrot.slane %v358_v43, 2  ;;  %p629_p7 = pnand %p628_p6, %p622_p1 }
  0x3d   : > { %v366_v48 = vrot.slane %v365_v44, 2 }
  0x3e   : > { %v346_v45 = vadd.f32 %v345_v41, %v344_v33  ;;  %v353_v46 = vadd.f32 %v352_v42, %v351_v34  ;;  %v360_v51 = vadd.f32 %v359_v47, %v358_v43 }
  0x3f   : > { %v367_v52 = vadd.f32 %v366_v48, %v365_v44 }
  0x40   : > { %v347_v49 = vrot.slane %v346_v45, 1  ;;  %v354_v50 = vrot.slane %v353_v46, 1  ;;  %v361_v55 = vrot.slane %v360_v51, 1 }
  0x41   : > { %v368_v56 = vrot.slane %v367_v52, 1 }
  0x42   : > { %v348_v53 = vadd.f32 %v347_v49, %v346_v45  ;;  %v355_v54 = vadd.f32 %v354_v50, %v353_v46  ;;  %v362_v57 = vadd.f32 %v361_v55, %v360_v51 }
  0x43   : > { %v369_v59 = vadd.f32 %v368_v56, %v367_v52 }
  0x44   : > { %v374_v58 = vsel %vm292_vm1, %v355_v54, %v348_v53  ;;  %v582_v62 = vpop.eup %581 }
  0x45   : > { %v375_v60 = vsel %vm294_vm2, %v362_v57, %v374_v58  ;;  %v243_v0 = vsel %vm223_vm0, %v582_v62, 0.0 }
  0x46   : > { %v376_v61 = vsel %vm296_vm3, %v369_v59, %v375_v60  ;;  %v584_v63 = vpop.eup %583 }
  0x47   : > { %508 = vst [vmem:[%s843_s5 + $0x8] sm:$0xf] %v376_v61  ;;  %v586_v1 = vpop.eup %585  ;;  %v244_v2 = vsel %vm223_vm0, %v584_v63, 0.0 }
  0x48   : > { %v588_v3 = vpop.eup %587  ;;  %v245_v4 = vadd.f32 %v244_v2, %v243_v0  ;;  %v246_v5 = vsel %vm223_vm0, %v586_v1, 0.0 }
  0x49   : > { %v248_v6 = vsel %vm223_vm0, %v588_v3, 0.0 }
  0x4a   : > { %v247_v7 = vadd.f32 %v246_v5, %v245_v4 }
  0x4c   : > { %v249_v8 = vadd.f32 %v248_v6, %v247_v7 }
  0x4e   : > { %589 = vrcp.f32 %v249_v8 }
  0x5b   : > { %v590_v9 = vpop.eup %589 }
  0x5c   : > { %v252_v10 = vmul.f32 %v590_v9, %v582_v62  ;;  %v253_v11 = vmul.f32 %v590_v9, %v584_v63  ;;  %v254_v12 = vmul.f32 %v590_v9, %v586_v1  ;;  %v255_v13 = vmul.f32 %v590_v9, %v588_v3 }
  0x5e   : > { %v256_v14 = vmul.f32 %v252_v10, %v823_v16  ;;  %v257_v15 = vmul.f32 %v253_v11, %v825_v17  ;;  %v258_v18 = vmul.f32 %v254_v12, %v827_v20  ;;  %v259_v19 = vmul.f32 %v255_v13, %v829_v21 }
  0x5f   : > { %v300_v22 = vmul.f32 %v252_v10, %v252_v10  ;;  %v301_v23 = vmul.f32 %v253_v11, %v253_v11  ;;  %v302_v24 = vmul.f32 %v254_v12, %v254_v12  ;;  %v303_v25 = vmul.f32 %v255_v13, %v255_v13 }
  0x60   : > { %v260_v26 = vsel %vm223_vm0, %v256_v14, 0.0  ;;  %v267_v27 = vsel %vm223_vm0, %v257_v15, 0.0  ;;  %v274_v28 = vsel %vm223_vm0, %v258_v18, 0.0  ;;  %v281_v29 = vsel %vm223_vm0, %v259_v19, 0.0 }
  0x61   : > { %v261_v30 = vrot.slane %v260_v26, 4  ;;  %v268_v16 = vrot.slane %v267_v27, 4  ;;  %v275_v31 = vrot.slane %v274_v28, 4  ;;  %v282_v17 = vrot.slane %v281_v29, 4 }
  0x62   : > { %v304_v20 = vsel %vm223_vm0, %v300_v22, 0.0  ;;  %v311_v21 = vsel %vm223_vm0, %v301_v23, 0.0  ;;  %v318_v32 = vsel %vm223_vm0, %v302_v24, 0.0  ;;  %v325_v33 = vsel %vm223_vm0, %v303_v25, 0.0 }
  0x63   : > { %v262_v34 = vadd.f32 %v261_v30, %v260_v26  ;;  %v269_v35 = vadd.f32 %v268_v16, %v267_v27  ;;  %v276_v36 = vadd.f32 %v275_v31, %v274_v28  ;;  %v283_v37 = vadd.f32 %v282_v17, %v281_v29 }
  0x64   : > { %v305_v38 = vrot.slane %v304_v20, 4  ;;  %v312_v39 = vrot.slane %v311_v21, 4  ;;  %v319_v40 = vrot.slane %v318_v32, 4  ;;  %v326_v41 = vrot.slane %v325_v33, 4 }
  0x65   : > { %v263_v42 = vrot.slane %v262_v34, 2  ;;  %v270_v43 = vrot.slane %v269_v35, 2  ;;  %v277_v44 = vrot.slane %v276_v36, 2  ;;  %v284_v45 = vrot.slane %v283_v37, 2 }
  0x66   : > { %v306_v46 = vadd.f32 %v305_v38, %v304_v20  ;;  %v313_v47 = vadd.f32 %v312_v39, %v311_v21  ;;  %v320_v48 = vadd.f32 %v319_v40, %v318_v32  ;;  %v327_v49 = vadd.f32 %v326_v41, %v325_v33 }
  0x67   : > { %v264_v50 = vadd.f32 %v263_v42, %v262_v34  ;;  %v271_v51 = vadd.f32 %v270_v43, %v269_v35  ;;  %v278_v52 = vadd.f32 %v277_v44, %v276_v36  ;;  %v285_v53 = vadd.f32 %v284_v45, %v283_v37 }
  0x68   : > { %v307_v54 = vrot.slane %v306_v46, 2  ;;  %v314_v55 = vrot.slane %v313_v47, 2  ;;  %v321_v56 = vrot.slane %v320_v48, 2  ;;  %v328_v57 = vrot.slane %v327_v49, 2 }
  0x69   : > { %v265_v58 = vrot.slane %v264_v50, 1  ;;  %v272_v59 = vrot.slane %v271_v51, 1  ;;  %v279_v60 = vrot.slane %v278_v52, 1  ;;  %v286_v61 = vrot.slane %v285_v53, 1 }
  0x6a   : > { %v308_v62 = vadd.f32 %v307_v54, %v306_v46  ;;  %v315_v63 = vadd.f32 %v314_v55, %v313_v47  ;;  %v322_v0 = vadd.f32 %v321_v56, %v320_v48  ;;  %v329_v1 = vadd.f32 %v328_v57, %v327_v49 }
  0x6b   : > { %v266_v2 = vadd.f32 %v265_v58, %v264_v50  ;;  %v273_v3 = vadd.f32 %v272_v59, %v271_v51  ;;  %v280_v4 = vadd.f32 %v279_v60, %v278_v52  ;;  %v287_v5 = vadd.f32 %v286_v61, %v285_v53 }
  0x6c   : > { %v309_v6 = vrot.slane %v308_v62, 1  ;;  %v316_v7 = vrot.slane %v315_v63, 1  ;;  %v323_v8 = vrot.slane %v322_v0, 1  ;;  %v330_v9 = vrot.slane %v329_v1, 1 }
  0x6d   : > { %v293_v10 = vsel %vm292_vm1, %v273_v3, %v266_v2 }
  0x6e   : > { %v295_v11 = vsel %vm294_vm2, %v280_v4, %v293_v10  ;;  %v310_v12 = vadd.f32 %v309_v6, %v308_v62  ;;  %v317_v13 = vadd.f32 %v316_v7, %v315_v63  ;;  %v324_v14 = vadd.f32 %v323_v8, %v322_v0 }
  0x6f   : > { %v297_v15 = vsel %vm296_vm3, %v287_v5, %v295_v11  ;;  %v331_v18 = vadd.f32 %v330_v9, %v329_v1 }
  0x70   : > { %299 = vst [vmem:[%s843_s5] sm:$0xf] %v297_v15  ;;  %v336_v19 = vsel %vm292_vm1, %v317_v13, %v310_v12 }
  0x71   : > { %v337_v22 = vsel %vm294_vm2, %v324_v14, %v336_v19 }
  0x72   : > { %v338_v23 = vsel %vm296_vm3, %v331_v18, %v337_v22 }
  0x73   : > { %507 = vst [vmem:[%s843_s5 + $0x4] sm:$0xf] %v338_v23 }
  0x74   : > { %632 = shalt.err (!%p629_p7)
}
  0x75   : > { %s633_s27 = scalar_lea.hbm %s872_s12, 192  ;;  %s637_s30 = scalar_lea.hbm %s927_s2, 384 }
  0x76   : > { %p634_p10 = scmp.ne.s32.totalorder %s872_s12, %s633_s27  ;;  %p638_p2 = scmp.lt.s32.totalorder %s872_s12, %s927_s2 }
  0x77   : > { %p639_p12 = scmp.lt.s32.totalorder %s637_s30, %s633_s27 }
  0x78   : > { %p635_p4 = pnand %p634_p10, %p773_p9 }
  0x79   : > { %p640_p8 = por %p639_p12, %p638_p2 }
  0x7a   : > { %p636_p13 = pneg %p635_p4 }
  0x7c   : > { %p641_p0 = pnand %p640_p8, %p636_p13 }
  0x7e   : > { %644 = shalt.err (!%p641_p0)
}
  0x7f   : > { %s705_s21 = smov 64   ;;  %s706_s5 = smov 4  }
  0x80   : > { %517 = dma.vmem_to_hbm [thread:$0]  (%p773_p9), %s874_s7, 192, %s872_s12, %s381_s16, %s705_s21, %s705_s21, %s706_s5  }
  0x81 PF: > { %s411_s6 = sand.u32 1, %s679_s9   ;;  %p933_p1 = scmp.ge.s32.totalorder %s699_s14, 2 }
  0x82   : > { %s412_s8 = scalar_lea.sflag [#allocation4], %s411_s6 }
  0x83   : > { %p524_p3 = pnand %p933_p1, %p780_p11 }
  0x85   : > { %p525_p5 = pneg %p524_p3 }
  0x87   : > { %674 = dma.done.wait (%p525_p5), %s412_s8, 192  }
  0x88   : > { %676 = vsyncadd (%p525_p5), %s412_s8, 4294967104  ;;  %s18_s14 = sadd.s32 1, %s699_s14   ;;  %s934_s9 = smov %s683_s10 }
  0x89   : > { %p15_p6 = scmp.ge.s32.totalorder %s18_s14, 4   ;;  %s935_s10 = smov %s687_s11 }
  0x8a   : > { %s936_s11 = smov %s778_s23  ;;  %s937_s12 = smov %s695_s13 }
  0x8b   : > { %s938_s13 = smov %s940_s17  ;;  %17 = sbr.rel (!%p15_p6) target bundleno = 6 (0x6), region = 78 }
  0x90   :  { %417 = vsyncpa [#allocation3], 1 }
  0x91   :  { %419 = vsyncpa [#allocation3 + $0x1], 1 }
  0x92   :  { %420 = vsyncpa [#allocation4], 1 }
  0x93   :  { %422 = vsyncpa [#allocation4 + $0x1], 1 }

</bundles_post_ra>
